<compile_context>
chip_gen: v7x
topology: tpu7x:2x2x1
jax: 0.10.0
libtpu: 0.0.40
codegen_flags: <defaults>
</compile_context>

<pallas_src>
import functools

import jax
import jax.numpy as jnp
from jax.experimental import pallas as pl
from jax.experimental.pallas import tpu as pltpu


def _round_up(x, m):
    return (x + m - 1) // m * m


def _space_sim_kernel(a_ref, b_ref, tr_ref, tc_ref, out_ref, *,
                      n_valid, tm, tn, masked):
    i = pl.program_id(0)   # row tile   (parallel)
    b = pl.program_id(1)   # batch tile (parallel)
    j = pl.program_id(2)   # col tile   (reduction; out block resident over j)

    @pl.when(j == 0)
    def _():
        out_ref[...] = jnp.zeros_like(out_ref)

    a = a_ref[...]     # (bt, TM, D+2)  rows: [x, |x|^2, 1]
    bb = b_ref[...]    # (bt, D+2, TN)  cols: [-2x, 1, |x|^2]

    # Pairwise squared distances come straight out of the MXU (norms folded in).
    d2 = jnp.einsum("bmd,bdn->bmn", a, bb,
                    preferred_element_type=jnp.float32)          # (bt, TM, TN)
    d2 = jnp.maximum(d2, 0.0)          # guard MXU roundoff for coincident points
    d = jnp.sqrt(d2)                   # distance_pred

    # where(t_i == t_j, d, d/(d^2+1e-5)); same-label branch kept exact,
    # different-label branch uses the EUP approximate reciprocal.
    # TODO(synk): if the bundle ever shows EUP binding, fuse sqrt+rcp into a
    # single rsqrt (needs a tiny-guard against 0*inf for coincident points).
    same = tr_ref[...] == tc_ref[...]                             # (bt, TM, TN)
    inv_d = d * pl.reciprocal(d2 + 1e-5, approx=True)
    vals = jnp.where(same, d, inv_d)

    def accumulate(v):
        partial = jnp.sum(v, axis=0)                      # (TM, TN) fold batch tile
        partial = jnp.sum(partial, axis=0, keepdims=True)  # (1, TN)  fold rows
        out_ref[...] += partial.reshape(1, 1, tn)          # lane-resident accum

    if masked:  # N was padded up to a tile multiple: mask only on boundary tiles
        boundary = jnp.logical_or(i == pl.num_programs(0) - 1,
                                  j == pl.num_programs(2) - 1)

        @pl.when(boundary)
        def _():
            row_ids = i * tm + jax.lax.broadcasted_iota(jnp.int32, (1, tm, 1), 1)
            col_ids = j * tn + jax.lax.broadcasted_iota(jnp.int32, (1, 1, tn), 2)
            valid = jnp.logical_and(row_ids < n_valid, col_ids < n_valid)
            accumulate(jnp.where(valid, vals, 0.0))

        @pl.when(jnp.logical_not(boundary))
        def _():
            accumulate(vals)
    else:
        accumulate(vals)


def _choose_tiling(B, N):
    """Pick (T, n_pad, bt, b_pad) so each grid step does ~1M elements
    (amortizes ~600-cycle per-step overhead) while every (bt,T,T) f32 temp
    stays <= 4 MiB (safe for v7x's 64 MiB physical VMEM)."""
    best = None
    for T in (128, 256, 512, 1024):
        n_pad = _round_up(N, T)
        gi = n_pad // T
        bt = max(1, min(B, (1 << 20) // (T * T)))   # bt*T*T <= 1M elems
        b_pad = _round_up(B, bt)
        gb = b_pad // bt
        steps = gi * gi * gb
        # crude cost model: per-step overhead + ~12 VALU ops/elem over 4 slots
        elem_cycles = bt * T * T * (12.0 / (4.0 * 1024.0))
        cost = steps * (600.0 + elem_cycles)
        if best is None or cost < best[0]:
            best = (cost, T, n_pad, bt, b_pad)
    return best[1], best[2], best[3], best[4]


def space_similarity_loss(points, target, foc_ind=None):
    """points: (B, N, D) float, target: (B, N) labels. Returns scalar f32 loss."""
    if foc_ind is not None:
        # glue: optional focal-index selection stays in plain JAX
        target = target[:, foc_ind[1]]

    points = points.astype(jnp.float32)
    target = target.astype(jnp.float32)
    B, N, D = points.shape

    T, n_pad, bt, b_pad = _choose_tiling(B, N)
    gi = n_pad // T
    gb = b_pad // bt
    gj = n_pad // T
    masked = (n_pad != N)

    # Pad batch and N with zeros.  Padded batches contribute exactly 0 to the
    # sum; padded N rows/cols are masked inside the kernel (boundary tiles only).
    x = jnp.pad(points, ((0, b_pad - B), (0, n_pad - N), (0, 0)))
    t = jnp.pad(target, ((0, b_pad - B), (0, n_pad - N)))

    # Fold squared norms into the MXU operands; pre-transpose the col operand
    # so the kernel does a plain (M,K)x(K,N) contraction with lane-dense cols.
    sq = jnp.sum(x * x, axis=-1, keepdims=True)              # (b_pad, n_pad, 1)
    ones = jnp.ones_like(sq)
    a_op = jnp.concatenate([x, sq, ones], axis=-1)            # (b_pad, n_pad, D+2)
    b_op = jnp.concatenate([-2.0 * x, ones, sq], axis=-1)     # (b_pad, n_pad, D+2)
    b_op = jnp.transpose(b_op, (0, 2, 1))                     # (b_pad, D+2, n_pad)

    t_row = t[:, :, None]                                     # (b_pad, n_pad, 1)
    t_col = t[:, None, :]                                     # (b_pad, 1, n_pad)

    K = D + 2
    kernel = functools.partial(_space_sim_kernel,
                               n_valid=N, tm=T, tn=T, masked=masked)

    partials = pl.pallas_call(
        kernel,
        out_shape=jax.ShapeDtypeStruct((gi, gb, T), jnp.float32),
        grid_spec=pltpu.PrefetchScalarGridSpec(
            num_scalar_prefetch=0,
            grid=(gi, gb, gj),
            in_specs=[
                pl.BlockSpec((bt, T, K), lambda i, b, j: (b, i, 0)),  # rows [x,|x|^2,1]
                pl.BlockSpec((bt, K, T), lambda i, b, j: (b, 0, j)),  # cols [-2x,1,|x|^2]
                pl.BlockSpec((bt, T, 1), lambda i, b, j: (b, i, 0)),  # labels (rows)
                pl.BlockSpec((bt, 1, T), lambda i, b, j: (b, 0, j)),  # labels (cols)
            ],
            out_specs=pl.BlockSpec((1, 1, T), lambda i, b, j: (i, b, 0)),
        ),
        compiler_params=pltpu.CompilerParams(
            dimension_semantics=("parallel", "parallel", "arbitrary"),
            vmem_limit_bytes=48 * 1024 * 1024,
        ),
    )(a_op, b_op, t_row, t_col)

    # Tiny final reduction + mean normalization in plain JAX (true B, N).
    return jnp.sum(partials) / (float(B) * float(N) * float(N))


def _reference(points, target):
    # pure-JAX reference of the PyTorch forward (sanity check)
    x = points.astype(jnp.float32)
    diff = x[:, :, None, :] - x[:, None, :, :]
    d = jnp.sqrt(jnp.sum(diff * diff, axis=-1))
    inv_d = d / (d * d + 1e-5)
    tt = target.astype(jnp.float32)
    same = tt[:, :, None] == tt[:, None, :]
    return jnp.mean(jnp.where(same, d, inv_d))


if __name__ == "__main__":
    key = jax.random.PRNGKey(0)

    # Case 1: N a power of two (no padding mask at runtime unless T > N).
    k1, k2, k3, k4 = jax.random.split(key, 4)
    B, N, D = 2, 128, 8
    points = jax.random.normal(k1, (B, N, D), dtype=jnp.float32)
    target = jax.random.randint(k2, (B, N), 0, 5).astype(jnp.float32)
    loss = jax.block_until_ready(space_similarity_loss(points, target))
    ref = _reference(points, target)
    assert jnp.allclose(loss, ref, rtol=2e-3, atol=1e-4), (loss, ref)

    # Case 2: awkward N and B (exercises N padding mask + batch padding).
    B2, N2 = 3, 200
    points2 = jax.random.normal(k3, (B2, N2, D), dtype=jnp.float32)
    target2 = jax.random.randint(k4, (B2, N2), 0, 7).astype(jnp.float32)
    loss2 = jax.block_until_ready(space_similarity_loss(points2, target2))
    ref2 = _reference(points2, target2)
    assert jnp.allclose(loss2, ref2, rtol=2e-3, atol=1e-4), (loss2, ref2)

    print("KERNEL_OK")
</pallas_src>

<mosaic_0001>
module attributes {stable_mosaic.version = 11 : i64} {
  func.func @_space_sim_kernel(%arg0: i32, %arg1: i32, %arg2: i32, %arg3: memref<2x128x10xf32, #tpu.memory_space<vmem>>, %arg4: memref<2x10x128xf32, #tpu.memory_space<vmem>>, %arg5: memref<2x128x1xf32, #tpu.memory_space<vmem>>, %arg6: memref<2x1x128xf32, #tpu.memory_space<vmem>>, %arg7: memref<1x1x128xf32, #tpu.memory_space<vmem>>) attributes {dimension_semantics = [#tpu.dimension_semantics<parallel>, #tpu.dimension_semantics<parallel>, #tpu.dimension_semantics<arbitrary>], iteration_bounds = array<i64: 1, 1, 1>, scalar_prefetch = 0 : i64, scratch_operands = 0 : i64, tpu.core_type = #tpu.core_type<tc>, window_params = [{transform_indices = @transform_0, window_bounds = array<i64: 2, 128, 10>}, {transform_indices = @transform_1, window_bounds = array<i64: 2, 10, 128>}, {transform_indices = @transform_2, window_bounds = array<i64: 2, 128, 1>}, {transform_indices = @transform_3, window_bounds = array<i64: 2, 1, 128>}, {transform_indices = @transform_4, window_bounds = array<i64: 1, 1, 128>}]} {
    %c0_i32 = arith.constant 0 : i32
    %0 = arith.cmpi eq, %arg2, %c0_i32 : i32
    %1 = arith.extui %0 : i1 to i32
    %c0_i32_0 = arith.constant 0 : i32
    %2 = arith.cmpi ne, %1, %c0_i32_0 : i32
    scf.if %2 {
      %cst_22 = arith.constant 0.000000e+00 : f32
      %26 = vector.broadcast %cst_22 : f32 to vector<1x1x128xf32>
      %c0_23 = arith.constant 0 : index
      %c0_24 = arith.constant 0 : index
      %c0_25 = arith.constant 0 : index
      %27 = vector.load %arg7[%c0_23, %c0_24, %c0_25] : memref<1x1x128xf32, #tpu.memory_space<vmem>>, vector<1x1x128xf32>
      tpu.vector_store %arg7[%c0_23, %c0_24, %c0_25], %26 {strides = array<i32>} : memref<1x1x128xf32, #tpu.memory_space<vmem>>, vector<1x1x128xf32>,
    } else {
    }
    %c0 = arith.constant 0 : index
    %c0_1 = arith.constant 0 : index
    %c0_2 = arith.constant 0 : index
    %3 = vector.load %arg3[%c0, %c0_1, %c0_2] : memref<2x128x10xf32, #tpu.memory_space<vmem>>, vector<2x128x10xf32>
    %c0_3 = arith.constant 0 : index
    %c0_4 = arith.constant 0 : index
    %c0_5 = arith.constant 0 : index
    %4 = vector.load %arg4[%c0_3, %c0_4, %c0_5] : memref<2x10x128xf32, #tpu.memory_space<vmem>>, vector<2x10x128xf32>
    "tpu.trace_start"() <{level = 10 : i32, message = "bmd,bdn->bmn"}> : () -> ()
    %cst = arith.constant dense<0.000000e+00> : vector<2x128x128xf32>
    %5 = tpu.matmul %3, %4, %cst {dimension_numbers = #tpu.dot_dimension_numbers<[2], [1], [1], [2], [0, 0, 0, 1, 1, 2], [0], [0]>} : vector<2x128x10xf32>, vector<2x10x128xf32>, vector<2x128x128xf32> -> vector<2x128x128xf32>
    "tpu.trace_stop"() : () -> ()
    %cst_6 = arith.constant 0.000000e+00 : f32
    %6 = vector.broadcast %cst_6 : f32 to vector<2x128x128xf32>
    %7 = arith.maximumf %5, %6 : vector<2x128x128xf32>
    %8 = math.sqrt %7 : vector<2x128x128xf32>
    %c0_7 = arith.constant 0 : index
    %c0_8 = arith.constant 0 : index
    %c0_9 = arith.constant 0 : index
    %9 = vector.load %arg5[%c0_7, %c0_8, %c0_9] : memref<2x128x1xf32, #tpu.memory_space<vmem>>, vector<2x128x1xf32>
    %c0_10 = arith.constant 0 : index
    %c0_11 = arith.constant 0 : index
    %c0_12 = arith.constant 0 : index
    %10 = vector.load %arg6[%c0_10, %c0_11, %c0_12] : memref<2x1x128xf32, #tpu.memory_space<vmem>>, vector<2x1x128xf32>
    %11 = vector.broadcast %9 : vector<2x128x1xf32> to vector<2x128x128xf32>
    %12 = vector.broadcast %10 : vector<2x1x128xf32> to vector<2x128x128xf32>
    %13 = arith.cmpf oeq, %11, %12 : vector<2x128x128xf32>
    %cst_13 = arith.constant 9.99999974E-6 : f32
    %14 = vector.broadcast %cst_13 : f32 to vector<2x128x128xf32>
    %15 = arith.addf %7, %14 : vector<2x128x128xf32>
    %16 = tpu.reciprocal %15 {approx = true} : vector<2x128x128xf32> -> vector<2x128x128xf32>
    %17 = arith.mulf %8, %16 : vector<2x128x128xf32>
    %18 = arith.select %13, %8, %17 : vector<2x128x128xi1>, vector<2x128x128xf32>
    %cst_14 = arith.constant dense<0.000000e+00> : vector<128x128xf32>
    %19 = vector.multi_reduction <add>, %18, %cst_14 [0] : vector<2x128x128xf32> to vector<128x128xf32>
    %cst_15 = arith.constant dense<0.000000e+00> : vector<128xf32>
    %20 = vector.multi_reduction <add>, %19, %cst_15 [0] : vector<128x128xf32> to vector<128xf32>
    %21 = vector.shape_cast %20 : vector<128xf32> to vector<1x128xf32>
    %c0_16 = arith.constant 0 : index
    %c0_17 = arith.constant 0 : index
    %c0_18 = arith.constant 0 : index
    %22 = vector.load %arg7[%c0_16, %c0_17, %c0_18] : memref<1x1x128xf32, #tpu.memory_space<vmem>>, vector<1x1x128xf32>
    %23 = vector.shape_cast %21 : vector<1x128xf32> to vector<1x1x128xf32>
    %24 = arith.addf %22, %23 : vector<1x1x128xf32>
    %c0_19 = arith.constant 0 : index
    %c0_20 = arith.constant 0 : index
    %c0_21 = arith.constant 0 : index
    %25 = vector.load %arg7[%c0_19, %c0_20, %c0_21] : memref<1x1x128xf32, #tpu.memory_space<vmem>>, vector<1x1x128xf32>
    tpu.vector_store %arg7[%c0_19, %c0_20, %c0_21], %24 {strides = array<i32>} : memref<1x1x128xf32, #tpu.memory_space<vmem>>, vector<1x1x128xf32>,
    return
  }
  func.func @transform_0(%arg0: i32, %arg1: i32, %arg2: i32) -> (i32, i32, i32) {
    %c0_i32 = arith.constant 0 : i32
    %c0_i32_0 = arith.constant 0 : i32
    return %arg1, %arg0, %c0_i32 : i32, i32, i32
  }
  func.func @transform_1(%arg0: i32, %arg1: i32, %arg2: i32) -> (i32, i32, i32) {
    %c0_i32 = arith.constant 0 : i32
    %c0_i32_0 = arith.constant 0 : i32
    return %arg1, %c0_i32, %arg2 : i32, i32, i32
  }
  func.func @transform_2(%arg0: i32, %arg1: i32, %arg2: i32) -> (i32, i32, i32) {
    %c0_i32 = arith.constant 0 : i32
    %c0_i32_0 = arith.constant 0 : i32
    return %arg1, %arg0, %c0_i32 : i32, i32, i32
  }
  func.func @transform_3(%arg0: i32, %arg1: i32, %arg2: i32) -> (i32, i32, i32) {
    %c0_i32 = arith.constant 0 : i32
    %c0_i32_0 = arith.constant 0 : i32
    return %arg1, %c0_i32, %arg2 : i32, i32, i32
  }
  func.func @transform_4(%arg0: i32, %arg1: i32, %arg2: i32) -> (i32, i32, i32) {
    %c0_i32 = arith.constant 0 : i32
    %c0_i32_0 = arith.constant 0 : i32
    return %arg0, %arg1, %c0_i32 : i32, i32, i32
  }
}

</mosaic_0001>

<bundles_post_ra>
// kernel: tpu_custom_call.1
= control target key start
LH: loop header
LB: loop body
LE: loop exit
PB: predicated region body
PF: predicated region fallthrough
CT: control target
= control target key end

     0   :  { %vm108_vm0 = vcmask 1041408   ;;  %vm1429_vm1 = vmmov 1   ;;  %vm59_vm3 = vcmask 80896   ;;  %v1430_v8 = vmov 0   ;;  %s2469_s0 = inlined_call_operand.vmem [shape: f32[2,128,10], index: 0, kind: input, shape index: {}]   ;;  %s2470_s1 = inlined_call_operand.vmem [shape: f32[2,10,128], index: 1, kind: input, shape index: {}]   ;;  %s2471_s2 = inlined_call_operand.vmem [shape: f32[2,128,1], index: 2, kind: input, shape index: {}]   ;;  %s2472_s3 = inlined_call_operand.vmem [shape: f32[2,1,128], index: 3, kind: input, shape index: {}]   ;;  %s2473_s4 = inlined_call_operand.hbm [shape: f32[1,1,128], index: 4, kind: output, shape index: {}]  }
   0x1   :  { %v55_v0 = vld [vmem:[%s2470_s1] sm:$0xff]  ;;  %v56_v1 = vld [vmem:[%s2470_s1 + $0x8] sm:$0x3]  ;;  %v57_v2 = vld [vmem:[%s2470_s1 + $0x10] sm:$0xff]  ;;  %1274 = vset.pattern.permute.xlu1 %v1430_v8  ;;  %1273 = vset.pattern.permute.xlu0 %v1430_v8 }
   0x2   :  { %v1257_v3 = vpack.c.bf16 %v56_v1, %v55_v0  ;;  %vm1258_vm2 = vmpackc.low %vm108_vm0, %vm1429_vm1  ;;  %v58_v4 = vld [vmem:[%s2470_s1 + $0x18] sm:$0x3]  ;;  %v23_v5 = vld [vmem:[%s2469_s0] sm:$0xff] }
   0x3   :  { %v1263_v6 = vpack.c.bf16 %v58_v4, %v57_v2  ;;  %1205 = vmatprep.mubr.msk.f32.mxu0 %vm59_vm3, %v23_v5  ;;  %v39_v7 = vld [vmem:[%s2469_s0 + $0x80] sm:$0xff]  ;;  %v24_v9 = vld [vmem:[%s2469_s0 + $0x8] sm:$0xff]  ;;  %v25_v11 = vld [vmem:[%s2469_s0 + $0x10] sm:$0xff] }
   0x4   :  { %1259 = vmatprep.subr.msk.bf16.mxu0 %vm1258_vm2, %v1257_v3  ;;  %1233 = vmatprep.mubr.msk.f32.mxu1 %vm59_vm3, %v39_v7  ;;  %v40_v10 = vld [vmem:[%s2469_s0 + $0x88] sm:$0xff]  ;;  %v41_v12 = vld [vmem:[%s2469_s0 + $0x90] sm:$0xff]  ;;  %v709_v14 = vld [vmem:[%s2471_s2] sm:$0xff] }
   0x5   :  { %1265 = vmatprep.subr.msk.bf16.mxu1 %vm1258_vm2, %v1263_v6  ;;  %1262 = vmatpush3.bf16.msk.msra.mxu0 %vm1258_vm2, %v1257_v3  ;;  %v711_v13 = vld [vmem:[%s2471_s2 + $0x10] sm:$0xff]  ;;  %v26_v15 = vld [vmem:[%s2469_s0 + $0x18] sm:$0xff]  ;;  %v27_v17 = vld [vmem:[%s2469_s0 + $0x20] sm:$0xff] }
   0x6   :  { %1268 = vmatpush3.bf16.msk.msra.mxu1 %vm1258_vm2, %v1263_v6  ;;  %v42_v16 = vld [vmem:[%s2469_s0 + $0x98] sm:$0xff]  ;;  %755 = vperm.xlu1 %1274, %v711_v13   ;;  %v43_v18 = vld [vmem:[%s2469_s0 + $0xa0] sm:$0xff]  ;;  %v710_v20 = vld [vmem:[%s2471_s2 + $0x8] sm:$0xff] }
   0x7   :  { %745 = vperm.xlu0 %1273, %v709_v14   ;;  %v712_v19 = vld [vmem:[%s2471_s2 + $0x18] sm:$0xff]  ;;  %v28_v21 = vld [vmem:[%s2469_s0 + $0x28] sm:$0xff]  ;;  %v29_v23 = vld [vmem:[%s2469_s0 + $0x30] sm:$0xff] }
   0x8   :  { %1206 = vmatmul.mubr.msk.f32.vlgmr.msra.gmra.mrb[0].mxu0 %vm59_vm3, %v24_v9  ;;  %v44_v22 = vld [vmem:[%s2469_s0 + $0xa8] sm:$0xff]  ;;  %v45_v24 = vld [vmem:[%s2469_s0 + $0xb0] sm:$0xff]  ;;  %v725_v26 = vld [vmem:[%s2471_s2 + $0x80] sm:$0xff] }
   0x9   :  { %1234 = vmatmul.mubr.msk.f32.vlgmr.msra.gmra.mrb[0].mxu1 %vm59_vm3, %v40_v10  ;;  %1208 = vmatprep.mubr.msk.f32.mxu0 %vm59_vm3, %v25_v11  ;;  %v726_v25 = vld [vmem:[%s2471_s2 + $0x88] sm:$0xff]  ;;  %v30_v27 = vld [vmem:[%s2469_s0 + $0x38] sm:$0xff]  ;;  %v31_v29 = vld [vmem:[%s2469_s0 + $0x40] sm:$0xff] }
   0xa   :  { %1236 = vmatprep.mubr.msk.f32.mxu1 %vm59_vm3, %v41_v12  ;;  %760 = vperm.xlu1 %1274, %v712_v19   ;;  %v46_v28 = vld [vmem:[%s2469_s0 + $0xb8] sm:$0xff]  ;;  %v47_v30 = vld [vmem:[%s2469_s0 + $0xc0] sm:$0xff]  ;;  %v727_v32 = vld [vmem:[%s2471_s2 + $0x90] sm:$0xff] }
   0xb   :  { %750 = vperm.xlu0 %1273, %v710_v20   ;;  %v728_v31 = vld [vmem:[%s2471_s2 + $0x98] sm:$0xff]  ;;  %v32_v33 = vld [vmem:[%s2469_s0 + $0x48] sm:$0xff]  ;;  %v33_v35 = vld [vmem:[%s2469_s0 + $0x50] sm:$0xff] }
   0xc   :  { %1209 = vmatmul.mubr.msk.f32.gmra.mrb[2].mxu0 %vm59_vm3, %v26_v15  ;;  %v48_v34 = vld [vmem:[%s2469_s0 + $0xc8] sm:$0xff]  ;;  %v49_v36 = vld [vmem:[%s2469_s0 + $0xd0] sm:$0xff]  ;;  %v729_v37 = vld [vmem:[%s2471_s2 + $0xa0] sm:$0xff] }
   0xd   :  { %1237 = vmatmul.mubr.msk.f32.gmra.mrb[2].mxu1 %vm59_vm3, %v42_v16  ;;  %1211 = vmatprep.mubr.msk.f32.mxu0 %vm59_vm3, %v27_v17  ;;  %v713_v38 = vld [vmem:[%s2471_s2 + $0x20] sm:$0xff] }
   0xe   :  { %1239 = vmatprep.mubr.msk.f32.mxu1 %vm59_vm3, %v43_v18  ;;  %830 = vperm.xlu1 %1274, %v726_v25  }
   0xf   :  { %825 = vperm.xlu0 %1273, %v725_v26  }
  0x10   :  { %1212 = vmatmul.mubr.msk.f32.gmra.mrb[4].mxu0 %vm59_vm3, %v28_v21 }
  0x11   :  { %1240 = vmatmul.mubr.msk.f32.gmra.mrb[4].mxu1 %vm59_vm3, %v44_v22  ;;  %1214 = vmatprep.mubr.msk.f32.mxu0 %vm59_vm3, %v29_v23 }
  0x12   :  { %1242 = vmatprep.mubr.msk.f32.mxu1 %vm59_vm3, %v45_v24  ;;  %840 = vperm.xlu1 %1274, %v728_v31  }
  0x13   :  { %835 = vperm.xlu0 %1273, %v727_v32  }
  0x14   :  { %1215 = vmatmul.mubr.msk.f32.gmra.mrb[6].mxu0 %vm59_vm3, %v30_v27 }
  0x15   :  { %1243 = vmatmul.mubr.msk.f32.gmra.mrb[6].mxu1 %vm59_vm3, %v46_v28  ;;  %1217 = vmatprep.mubr.msk.f32.mxu0 %vm59_vm3, %v31_v29 }
  0x16   :  { %1245 = vmatprep.mubr.msk.f32.mxu1 %vm59_vm3, %v47_v30 }
  0x18   :  { %1218 = vmatmul.mubr.msk.f32.gmra.mrb[8].mxu0 %vm59_vm3, %v32_v33 }
  0x19   :  { %9 = vsyncpa [#allocation3], 0  ;;  %1246 = vmatmul.mubr.msk.f32.gmra.mrb[8].mxu1 %vm59_vm3, %v48_v34  ;;  %1220 = vmatprep.mubr.msk.f32.mxu0 %vm59_vm3, %v33_v35  ;;  %v34_v39 = vld [vmem:[%s2469_s0 + $0x58] sm:$0xff]  ;;  %v35_v41 = vld [vmem:[%s2469_s0 + $0x60] sm:$0xff]  ;;  %v1431_v7 = vmov 0.0  }
  0x1a   :  { %1248 = vmatprep.mubr.msk.f32.mxu1 %vm59_vm3, %v49_v36  ;;  %v50_v40 = vld [vmem:[%s2469_s0 + $0xd8] sm:$0xff]  ;;  %845 = vperm.xlu1 %1274, %v729_v37   ;;  %v51_v42 = vld [vmem:[%s2469_s0 + $0xe0] sm:$0xff]  ;;  %v730_v43 = vld [vmem:[%s2471_s2 + $0xa8] sm:$0xff]  ;;  %22 = vst [vmem:[#allocation2] sm:$0x1] %v1431_v7 }
  0x1b   :  { %765 = vperm.xlu0 %1273, %v713_v38   ;;  %v714_v44 = vld [vmem:[%s2471_s2 + $0x28] sm:$0xff]  ;;  %v37_v47 = vld [vmem:[%s2469_s0 + $0x70] sm:$0xff]  ;;  %v38_v51 = vld [vmem:[%s2469_s0 + $0x78] sm:$0xff] }
  0x1c   :  { %1221 = vmatmul.mubr.msk.f32.gmra.mrb[10].mxu0 %vm59_vm3, %v34_v39  ;;  %v36_v45 = vld [vmem:[%s2469_s0 + $0x68] sm:$0xff]  ;;  %v53_v48 = vld [vmem:[%s2469_s0 + $0xf0] sm:$0xff]  ;;  %v54_v52 = vld [vmem:[%s2469_s0 + $0xf8] sm:$0xff] }
  0x1d   :  { %1249 = vmatmul.mubr.msk.f32.gmra.mrb[10].mxu1 %vm59_vm3, %v50_v40  ;;  %1223 = vmatprep.mubr.msk.f32.mxu0 %vm59_vm3, %v35_v41  ;;  %v52_v46 = vld [vmem:[%s2469_s0 + $0xe8] sm:$0xff]  ;;  %v731_v49 = vld [vmem:[%s2471_s2 + $0xb0] sm:$0xff]  ;;  %v732_v53 = vld [vmem:[%s2471_s2 + $0xb8] sm:$0xff] }
  0x1e   :  { %1251 = vmatprep.mubr.msk.f32.mxu1 %vm59_vm3, %v51_v42  ;;  %850 = vperm.xlu1 %1274, %v730_v43   ;;  %v715_v50 = vld [vmem:[%s2471_s2 + $0x30] sm:$0xff]  ;;  %v716_v54 = vld [vmem:[%s2471_s2 + $0x38] sm:$0xff]  ;;  %v733_v55 = vld [vmem:[%s2471_s2 + $0xc0] sm:$0xff] }
  0x1f   :  { %770 = vperm.xlu0 %1273, %v714_v44   ;;  %v717_v56 = vld [vmem:[%s2471_s2 + $0x40] sm:$0xff]  ;;  %v734_v57 = vld [vmem:[%s2471_s2 + $0xc8] sm:$0xff]  ;;  %v735_v59 = vld [vmem:[%s2471_s2 + $0xd0] sm:$0xff] }
  0x20   :  { %1224 = vmatmul.mubr.msk.f32.gmra.mrb[12].mxu0 %vm59_vm3, %v36_v45  ;;  %v718_v58 = vld [vmem:[%s2471_s2 + $0x48] sm:$0xff]  ;;  %v719_v60 = vld [vmem:[%s2471_s2 + $0x50] sm:$0xff]  ;;  %v736_v61 = vld [vmem:[%s2471_s2 + $0xd8] sm:$0xff] }
  0x21   :  { %1252 = vmatmul.mubr.msk.f32.gmra.mrb[12].mxu1 %vm59_vm3, %v52_v46  ;;  %1226 = vmatprep.mubr.msk.f32.mxu0 %vm59_vm3, %v37_v47  ;;  %v720_v62 = vld [vmem:[%s2471_s2 + $0x58] sm:$0xff]  ;;  %v737_v63 = vld [vmem:[%s2471_s2 + $0xe0] sm:$0xff]  ;;  %v738_v1 = vld [vmem:[%s2471_s2 + $0xe8] sm:$0xff] }
  0x22   :  { %1254 = vmatprep.mubr.msk.f32.mxu1 %vm59_vm3, %v53_v48  ;;  %855 = vperm.xlu1 %1274, %v731_v49   ;;  %v721_v0 = vld [vmem:[%s2471_s2 + $0x60] sm:$0xff]  ;;  %v722_v2 = vld [vmem:[%s2471_s2 + $0x68] sm:$0xff]  ;;  %v739_v3 = vld [vmem:[%s2471_s2 + $0xf0] sm:$0xff] }
  0x23   :  { %775 = vperm.xlu0 %1273, %v715_v50   ;;  %v723_v4 = vld [vmem:[%s2471_s2 + $0x70] sm:$0xff]  ;;  %v740_v5 = vld [vmem:[%s2471_s2 + $0xf8] sm:$0xff]  ;;  %v1723_v29 = vld [vmem:[%s2472_s3] ss:$0 sm:$0xff] }
  0x24   :  { %1227 = vmatmul.mubr.msk.f32.gmra.mrb[14].mxu0 %vm59_vm3, %v38_v51  ;;  %v724_v6 = vld [vmem:[%s2471_s2 + $0x78] sm:$0xff]  ;;  %v1728_v30 = vld [vmem:[%s2472_s3 + $0x1] ss:$0 sm:$0xff] }
  0x25   :  { %1255 = vmatmul.mubr.msk.f32.gmra.mrb[14].mxu1 %vm59_vm3, %v54_v52 }
  0x26   :  { %860 = vperm.xlu1 %1274, %v732_v53  }
  0x27   :  { %780 = vperm.xlu0 %1273, %v716_v54  }
  0x2a   :  { %865 = vperm.xlu1 %1274, %v733_v55  }
  0x2b   :  { %785 = vperm.xlu0 %1273, %v717_v56  }
  0x2e   :  { %870 = vperm.xlu1 %1274, %v734_v57  }
  0x2f   :  { %790 = vperm.xlu0 %1273, %v718_v58  }
  0x32   :  { %875 = vperm.xlu1 %1274, %v735_v59  }
  0x33   :  { %795 = vperm.xlu0 %1273, %v719_v60  }
  0x36   :  { %880 = vperm.xlu1 %1274, %v736_v61  }
  0x37   :  { %800 = vperm.xlu0 %1273, %v720_v62  }
  0x3a   :  { %885 = vperm.xlu1 %1274, %v737_v63  }
  0x3b   :  { %805 = vperm.xlu0 %1273, %v721_v0  }
  0x3e   :  { %890 = vperm.xlu1 %1274, %v738_v1  }
  0x3f   :  { %810 = vperm.xlu0 %1273, %v722_v2  }
  0x42   :  { %895 = vperm.xlu1 %1274, %v739_v3  }
  0x43   :  { %815 = vperm.xlu0 %1273, %v723_v4  }
  0x46   :  { %900 = vperm.xlu1 %1274, %v740_v5  }
  0x47   :  { %820 = vperm.xlu0 %1273, %v724_v6  }
  0x85   :  { %v1696_v9 = vpop.permute.xlu1 %755 }
  0x86   :  { %v1694_v8 = vpop.permute.xlu0 %745 }
  0x87   :  { %vm915_vm12 = vcmp.eq.f32.partialorder %v1694_v8, %v1723_v29 }
  0x89   :  { %v1707_v18 = vpop.permute.xlu1 %760 }
  0x8a   :  { %v1700_v14 = vpop.permute.xlu0 %750 }
  0x8b   :  { %vm916_vm8 = vcmp.eq.f32.partialorder %v1700_v14, %v1723_v29 }
  0x8d   :  { %v1741_v36 = vpop.permute.xlu1 %830 }
  0x8e   :  { %v1730_v31 = vpop.permute.xlu0 %825  ;;  %vm932_vm10 = vcmp.eq.f32.partialorder %v1741_v36, %v1728_v30 }
  0x8f   :  { %vm931_vm3 = vcmp.eq.f32.partialorder %v1730_v31, %v1728_v30 }
  0x91   :  { %v1786_v59 = vpop.permute.xlu1 %840 }
  0x92   :  { %v1773_v51 = vpop.permute.xlu0 %835 }
  0xdb   :  { %v1207_v10 = vpop.f32.mrb[0].mxu0 }
  0xdc   :  { %v1698_v11 = vmax.f32 %v1207_v10, 0.0  ;;  %v1235_v12 = vpop.f32.mrb[0].mxu1  ;;  %v178_v13 = vpop.f32.mrb[1].mxu0 }
  0xdd   :  { %v1702_v15 = vmax.f32 %v1235_v12, 0.0  ;;  %v1704_v16 = vmax.f32 %v178_v13, 0.0  ;;  %v374_v17 = vpop.f32.mrb[1].mxu1 }
  0xde   :  { %1275 = vrsqrt.f32 %v1698_v11  ;;  %v948_v19 = vadd.f32 1e-05, %v1698_v11  ;;  %v1714_v26 = vmax.f32 %v374_v17, 0.0  ;;  %vm494_vm4 = vcmp.eq.f32.partialorder %v1698_v11, inf }
  0xdf   :  { %1277 = vrsqrt.f32 %v1702_v15  ;;  %v1210_v20 = vpop.f32.mrb[2].mxu0  ;;  %v964_v21 = vadd.f32 1e-05, %v1702_v15  ;;  %v947_v24 = vadd.f32 1e-05, %v1704_v16  ;;  %vm496_vm5 = vcmp.eq.f32.partialorder %v1698_v11, 0.0 }
  0xe0   :  { %1279 = vrsqrt.f32 %v1704_v16  ;;  %v1238_v22 = vpop.f32.mrb[2].mxu1  ;;  %v188_v23 = vpop.f32.mrb[3].mxu0  ;;  %v1716_v27 = vmax.f32 %v1210_v20, 0.0  ;;  %v497_v33 = vand.u32 2147483648, %v1698_v11  ;;  %vm606_vm6 = vcmp.eq.f32.partialorder %v1702_v15, inf }
  0xe1   :  { %1281 = vrcp.f32 %v948_v19  ;;  %v384_v25 = vpop.f32.mrb[3].mxu1  ;;  %v1718_v28 = vmax.f32 %v1238_v22, 0.0  ;;  %vm608_vm7 = vcmp.eq.f32.partialorder %v1702_v15, 0.0  ;;  %v963_v37 = vadd.f32 1e-05, %v1714_v26 }
  0xe2   :  { %1283 = vrcp.f32 %v964_v21  ;;  %v1746_v38 = vmax.f32 %v188_v23, 0.0  ;;  %v609_v40 = vand.u32 2147483648, %v1702_v15  ;;  %vm487_vm9 = vcmp.eq.f32.partialorder %v1704_v16, inf  ;;  %v1826_v21 = vpop.permute.xlu0 %765 }
  0xe3   :  { %1285 = vrcp.f32 %v947_v24  ;;  %v1213_v32 = vpop.f32.mrb[4].mxu0  ;;  %v950_v41 = vadd.f32 1e-05, %v1716_v27  ;;  %vm489_vm11 = vcmp.eq.f32.partialorder %v1704_v16, 0.0  ;;  %v966_v42 = vadd.f32 1e-05, %v1718_v28 }
  0xe4   :  { %1287 = vrsqrt.f32 %v1714_v26  ;;  %v1737_v34 = vpop.f32.mrb[4].mxu1  ;;  %v1739_v35 = vpop.f32.mrb[5].mxu0  ;;  %v1760_v43 = vmax.f32 %v384_v25, 0.0  ;;  %v490_v46 = vand.u32 2147483648, %v1704_v16  ;;  %vm599_vm13 = vcmp.eq.f32.partialorder %v1714_v26, inf }
  0xe5   :  { %1289 = vrsqrt.f32 %v1716_v27  ;;  %v1748_v39 = vpop.f32.mrb[5].mxu1  ;;  %v602_v47 = vand.u32 2147483648, %v1714_v26  ;;  %vm601_vm14 = vcmp.eq.f32.partialorder %v1714_v26, 0.0  ;;  %vm508_vm15 = vcmp.eq.f32.partialorder %v1716_v27, inf }
  0xe6   :  { %1291 = vrsqrt.f32 %v1718_v28  ;;  %v949_v53 = vadd.f32 1e-05, %v1746_v38  ;;  %vm510_vm0 = vcmp.eq.f32.partialorder %v1716_v27, 0.0  ;;  %v511_v57 = vand.u32 2147483648, %v1716_v27 }
  0xe7   :  { %1293 = vrcp.f32 %v963_v37  ;;  %v1762_v44 = vpop.f32.mrb[6].mxu0  ;;  %vm620_vm1 = vcmp.eq.f32.partialorder %v1718_v28, inf  ;;  %vm622_vm2 = vcmp.eq.f32.partialorder %v1718_v28, 0.0  ;;  %v623_v62 = vand.u32 2147483648, %v1718_v28 }
  0xe8   :  { %v1276_v45 = vpop.eup %1275  ;;  %1295 = vrcp.f32 %v950_v41  ;;  %v1769_v48 = vpop.f32.mrb[6].mxu1  ;;  %v965_v63 = vadd.f32 1e-05, %v1760_v43  ;;  %v1805_v4 = vmax.f32 %v1213_v32, 0.0  ;;  %v504_v25 = vand.u32 2147483648, %v1746_v38 }
  0xe9   :  { %v1771_v49 = vpop.f32.mrb[7].mxu0  ;;  %v1278_v50 = vpop.eup %1277  ;;  %v493_v52 = vmul.f32 %v1276_v45, %v1698_v11  ;;  %1297 = vrcp.f32 %v966_v42 }
  0xea   :  { %v1779_v54 = vpop.f32.mrb[7].mxu1  ;;  %v1280_v55 = vpop.eup %1279  ;;  %v605_v56 = vmul.f32 %v1278_v50, %v1702_v15  ;;  %1299 = vrsqrt.f32 %v1746_v38  ;;  %v952_v14 = vadd.f32 1e-05, %v1805_v4 }
  0xeb   :  { %v1282_v58 = vpop.eup %1281  ;;  %v495_v60 = vsel %vm494_vm4, %v1698_v11, %v493_v52  ;;  %v486_v61 = vmul.f32 %v1280_v55, %v1704_v16  ;;  %v1795_v0 = vpop.f32.mrb[8].mxu0  ;;  %1301 = vrsqrt.f32 %v1760_v43  ;;  %vm918_vm4 = vcmp.eq.f32.partialorder %v1707_v18, %v1723_v29 }
  0xec   :  { %v1284_v1 = vpop.eup %1283  ;;  %v498_v2 = vsel %vm496_vm5, %v497_v33, %v495_v60  ;;  %v607_v3 = vsel %vm606_vm6, %v1702_v15, %v605_v56  ;;  %v1807_v5 = vpop.f32.mrb[8].mxu1  ;;  %1303 = vrcp.f32 %v949_v53  ;;  %vm934_vm5 = vcmp.eq.f32.partialorder %v1786_v59, %v1728_v30 }
  0xed   :  { %v1809_v6 = vpop.f32.mrb[9].mxu0  ;;  %v1286_v7 = vpop.eup %1285  ;;  %v1012_v10 = vmul.f32 %v1282_v58, %v498_v2  ;;  %v610_v11 = vsel %vm608_vm7, %v609_v40, %v607_v3  ;;  %v488_v12 = vsel %vm487_vm9, %v1704_v16, %v486_v61  ;;  %vm501_vm6 = vcmp.eq.f32.partialorder %v1746_v38, inf }
  0xee   :  { %v1818_v13 = vpop.f32.mrb[9].mxu1  ;;  %v1288_v17 = vpop.eup %1287  ;;  %v1028_v19 = vmul.f32 %v1284_v1, %v610_v11  ;;  %v491_v20 = vsel %vm489_vm11, %v490_v46, %v488_v12  ;;  %1305 = vrsqrt.f32 %v1805_v4  ;;  %vm503_vm7 = vcmp.eq.f32.partialorder %v1746_v38, 0.0 }
  0xef   :  { %v1290_v15 = vpop.eup %1289  ;;  %v1044_v22 = vsel %vm916_vm8, %v498_v2, %v1012_v10  ;;  %v1011_v23 = vmul.f32 %v1286_v7, %v491_v20  ;;  %v598_v24 = vmul.f32 %v1288_v17, %v1714_v26  ;;  %v1834_v16 = vpop.f32.mrb[10].mxu0  ;;  %1307 = vrcp.f32 %v965_v63 }
  0xf0   :  { %v1292_v32 = vpop.eup %1291  ;;  %v1060_v33 = vsel %vm932_vm10, %v610_v11, %v1028_v19  ;;  %v507_v37 = vmul.f32 %v1290_v15, %v1716_v27  ;;  %v1841_v40 = vpop.f32.mrb[10].mxu1  ;;  %vm917_vm8 = vcmp.eq.f32.partialorder %v1696_v9, %v1723_v29  ;;  %1309 = vrcp.f32 %v952_v14 }
  0xf1   :  { %v1843_v41 = vpop.f32.mrb[11].mxu0  ;;  %v1294_v42 = vpop.eup %1293  ;;  %v1076_v46 = vadd.f32 %v1060_v33, %v1044_v22  ;;  %v1043_v50 = vsel %vm915_vm12, %v491_v20, %v1011_v23  ;;  %v600_v36 = vsel %vm599_vm13, %v1714_v26, %v598_v24  ;;  %v619_v52 = vmul.f32 %v1292_v32, %v1718_v28 }
  0xf2   :  { %v1845_v45 = vpop.permute.xlu1 %845  ;;  %v1854_v53 = vpop.f32.mrb[11].mxu1  ;;  %v603_v56 = vsel %vm601_vm14, %v602_v47, %v600_v36  ;;  %v509_v8 = vsel %vm508_vm15, %v1716_v27, %v507_v37  ;;  %v1866_v58 = vmax.f32 %v1737_v34, 0.0  ;;  %v1876_v47 = vmax.f32 %v1739_v35, 0.0 }
  0xf3   :  { %v1296_v55 = vpop.eup %1295  ;;  %v1027_v61 = vmul.f32 %v1294_v42, %v603_v56  ;;  %v512_v63 = vsel %vm510_vm0, %v511_v57, %v509_v8  ;;  %v621_v26 = vsel %vm620_vm1, %v1718_v28, %v619_v52  ;;  %v1878_v1 = vpop.f32.mrb[12].mxu0  ;;  %vm613_vm9 = vcmp.eq.f32.partialorder %v1760_v43, inf }
  0xf4   :  { %v1298_v60 = vpop.eup %1297  ;;  %v1014_v3 = vmul.f32 %v1296_v55, %v512_v63  ;;  %v624_v34 = vsel %vm622_vm2, %v623_v62, %v621_v26  ;;  %1311 = vrsqrt.f32 %v1866_v58  ;;  %v1884_v27 = vpop.f32.mrb[12].mxu1  ;;  %vm615_vm10 = vcmp.eq.f32.partialorder %v1760_v43, 0.0 }
  0xf5   :  { %v1300_v2 = vpop.eup %1299  ;;  %v1886_v57 = vpop.f32.mrb[13].mxu0  ;;  %v1059_v35 = vsel %vm931_vm3, %v603_v56, %v1027_v61  ;;  %v1030_v10 = vmul.f32 %v1298_v60, %v624_v34  ;;  %v616_v19 = vand.u32 2147483648, %v1760_v43  ;;  %v968_v20 = vadd.f32 1e-05, %v1866_v58 }
  0xf6   :  { %v1888_v7 = vpop.permute.xlu0 %770  ;;  %v500_v11 = vmul.f32 %v1300_v2, %v1746_v38  ;;  %v1895_v28 = vpop.f32.mrb[13].mxu1  ;;  %v1075_v12 = vadd.f32 %v1059_v35, %v1043_v50  ;;  %v1046_v17 = vsel %vm918_vm4, %v512_v63, %v1014_v3  ;;  %1313 = vrsqrt.f32 %v1876_v47 }
  0xf7   :  { %v1302_v62 = vpop.eup %1301  ;;  %v1902_v31 = vpop.permute.xlu1 %850  ;;  %v1062_v22 = vsel %vm934_vm5, %v624_v34, %v1030_v10  ;;  %1315 = vrcp.f32 %v968_v20  ;;  %vm522_vm11 = vcmp.eq.f32.partialorder %v1805_v4, inf  ;;  %vm524_vm12 = vcmp.eq.f32.partialorder %v1805_v4, 0.0 }
  0xf8   :  { %v1304_v15 = vpop.eup %1303  ;;  %v502_v23 = vsel %vm501_vm6, %v1746_v38, %v500_v11  ;;  %v612_v24 = vmul.f32 %v1302_v62, %v1760_v43  ;;  %v1912_v18 = vpop.f32.mrb[14].mxu0  ;;  %v1091_v33 = vadd.f32 %v1076_v46, %v1075_v12  ;;  %v1078_v37 = vadd.f32 %v1062_v22, %v1046_v17 }
  0xf9   :  { %v1306_v32 = vpop.eup %1305  ;;  %v505_v14 = vsel %vm503_vm7, %v504_v25, %v502_v23  ;;  %v1916_v42 = vpop.f32.mrb[14].mxu1  ;;  %v525_v25 = vand.u32 2147483648, %v1805_v4  ;;  %v951_v56 = vadd.f32 1e-05, %v1876_v47  ;;  %v1939_v26 = vmax.f32 %v1748_v39, 0.0 }
  0xfa   :  { %v1918_v59 = vpop.f32.mrb[15].mxu0  ;;  %v1013_v50 = vmul.f32 %v1304_v15, %v505_v14  ;;  %v614_v36 = vsel %vm613_vm9, %v1760_v43, %v612_v24  ;;  %v521_v52 = vmul.f32 %v1306_v32, %v1805_v4  ;;  %v1925_v55 = vpop.f32.mrb[15].mxu1  ;;  %vm933_vm13 = vcmp.eq.f32.partialorder %v1773_v51, %v1728_v30 }
  0xfb   :  { %v1308_v46 = vpop.eup %1307  ;;  %v617_v38 = vsel %vm615_vm10, %v616_v19, %v614_v36  ;;  %v1932_v8 = vpop.permute.xlu0 %775  ;;  %1317 = vrcp.f32 %v951_v56  ;;  %v1944_v3 = vmax.f32 %v1762_v44, 0.0  ;;  %v1948_v9 = vmax.f32 %v1769_v48, 0.0 }
  0xfc   :  { %v1045_v60 = vsel %vm917_vm8, %v505_v14, %v1013_v50  ;;  %v1029_v61 = vmul.f32 %v1308_v46, %v617_v38  ;;  %v523_v63 = vsel %vm522_vm11, %v1805_v4, %v521_v52  ;;  %v1310_v43 = vpop.eup %1309  ;;  %1319 = vrsqrt.f32 %v1939_v26  ;;  %v1954_v39 = vpop.permute.xlu1 %855 }
  0xfd   :  { %v526_v2 = vsel %vm524_vm12, %v525_v25, %v523_v63  ;;  %vm936_vm14 = vcmp.eq.f32.partialorder %v1902_v31, %v1728_v30  ;;  %vm920_vm15 = vcmp.eq.f32.partialorder %v1888_v7, %v1723_v29  ;;  %v967_v4 = vadd.f32 1e-05, %v1939_v26 }
  0xfe   :  { %v1061_v34 = vsel %vm933_vm13, %v617_v38, %v1029_v61  ;;  %v1312_v35 = vpop.eup %1311  ;;  %v1016_v44 = vmul.f32 %v1310_v43, %v526_v2  ;;  %vm634_vm0 = vcmp.eq.f32.partialorder %v1866_v58, inf  ;;  %1321 = vrsqrt.f32 %v1944_v3 }
  0xff   :  { %v1077_v51 = vadd.f32 %v1061_v34, %v1045_v60  ;;  %v633_v10 = vmul.f32 %v1312_v35, %v1866_v58  ;;  %vm636_vm1 = vcmp.eq.f32.partialorder %v1866_v58, 0.0  ;;  %v637_v11 = vand.u32 2147483648, %v1866_v58  ;;  %v1962_v12 = vpop.permute.xlu0 %780 }
 0x100   :  { %1323 = vrcp.f32 %v967_v4  ;;  %v1314_v62 = vpop.eup %1313  ;;  %vm515_vm2 = vcmp.eq.f32.partialorder %v1876_v47, inf  ;;  %v954_v19 = vadd.f32 1e-05, %v1944_v3  ;;  %v518_v23 = vand.u32 2147483648, %v1876_v47  ;;  %v1976_v14 = vpop.permute.xlu1 %860 }
 0x101   :  { %v1092_v48 = vadd.f32 %v1091_v33, %v1077_v51  ;;  %v635_v17 = vsel %vm634_vm0, %v1866_v58, %v633_v10  ;;  %1325 = vrsqrt.f32 %v1948_v9  ;;  %v1316_v20 = vpop.eup %1315  ;;  %v514_v22 = vmul.f32 %v1314_v62, %v1876_v47 }
 0x102   :  { %v638_v15 = vsel %vm636_vm1, %v637_v11, %v635_v17  ;;  %v1048_v32 = vsel %vm920_vm15, %v526_v2, %v1016_v44  ;;  %1327 = vrcp.f32 %v954_v19  ;;  %v970_v58 = vadd.f32 1e-05, %v1948_v9 }
 0x103   :  { %v1970_v24 = vadd.f32 %v1092_v48, %v1078_v37  ;;  %v1032_v33 = vmul.f32 %v1316_v20, %v638_v15  ;;  %v516_v50 = vsel %vm515_vm2, %v1876_v47, %v514_v22  ;;  %vm517_vm3 = vcmp.eq.f32.partialorder %v1876_v47, 0.0  ;;  %v2002_v38 = vpop.permute.xlu0 %785 }
 0x104   :  { %v1981_v36 = vmax.f32 %v1771_v49, 0.0  ;;  %v1984_v37 = vmax.f32 %v1779_v54, 0.0  ;;  %vm935_vm4 = vcmp.eq.f32.partialorder %v1845_v45, %v1728_v30  ;;  %vm919_vm5 = vcmp.eq.f32.partialorder %v1826_v21, %v1723_v29  ;;  %v2018_v34 = vpop.permute.xlu1 %865 }
 0x105   :  { %v1064_v7 = vsel %vm936_vm14, %v638_v15, %v1032_v33  ;;  %v519_v52 = vsel %vm517_vm3, %v518_v23, %v516_v50  ;;  %1329 = vrcp.f32 %v970_v58  ;;  %v1318_v46 = vpop.eup %1317  ;;  %vm627_vm6 = vcmp.eq.f32.partialorder %v1939_v26, inf }
 0x106   :  { %v1993_v47 = vadd.f32 %v1064_v7, %v1048_v32  ;;  %1331 = vrsqrt.f32 %v1981_v36  ;;  %v1998_v49 = vmax.f32 %v1795_v0, 0.0  ;;  %v1320_v54 = vpop.eup %1319  ;;  %vm922_vm7 = vcmp.eq.f32.partialorder %v1962_v12, %v1723_v29 }
 0x107   :  { %v1015_v31 = vmul.f32 %v1318_v46, %v519_v52  ;;  %vm629_vm8 = vcmp.eq.f32.partialorder %v1939_v26, 0.0  ;;  %v953_v25 = vadd.f32 1e-05, %v1981_v36  ;;  %1333 = vrsqrt.f32 %v1984_v37  ;;  %v2037_v17 = vpop.permute.xlu0 %790 }
 0x108   :  { %v626_v56 = vmul.f32 %v1320_v54, %v1939_v26  ;;  %v630_v60 = vand.u32 2147483648, %v1939_v26  ;;  %vm536_vm9 = vcmp.eq.f32.partialorder %v1944_v3, inf  ;;  %v2011_v0 = vmax.f32 %v1807_v5, 0.0  ;;  %v1322_v61 = vpop.eup %1321  ;;  %v2059_v50 = vpop.permute.xlu1 %870 }
 0x109   :  { %vm938_vm10 = vcmp.eq.f32.partialorder %v1976_v14, %v1728_v30  ;;  %vm538_vm11 = vcmp.eq.f32.partialorder %v1944_v3, 0.0  ;;  %v539_v63 = vand.u32 2147483648, %v1944_v3  ;;  %1335 = vrcp.f32 %v953_v25 }
 0x10a   :  { %v969_v43 = vadd.f32 1e-05, %v1984_v37  ;;  %v1324_v2 = vpop.eup %1323  ;;  %v628_v35 = vsel %vm627_vm6, %v1939_v26, %v626_v56  ;;  %v535_v5 = vmul.f32 %v1322_v61, %v1944_v3  ;;  %vm648_vm12 = vcmp.eq.f32.partialorder %v1948_v9, inf }
 0x10b   :  { %1337 = vrsqrt.f32 %v1998_v49  ;;  %v1326_v51 = vpop.eup %1325  ;;  %v1047_v4 = vsel %vm919_vm5, %v519_v52, %v1015_v31  ;;  %v631_v44 = vsel %vm629_vm8, %v630_v60, %v628_v35  ;;  %vm650_vm13 = vcmp.eq.f32.partialorder %v1948_v9, 0.0  ;;  %v2079_v60 = vpop.permute.xlu0 %795 }
 0x10c   :  { %1339 = vrcp.f32 %v969_v43  ;;  %v1031_v10 = vmul.f32 %v1324_v2, %v631_v44  ;;  %v537_v48 = vsel %vm536_vm9, %v1944_v3, %v535_v5  ;;  %v647_v11 = vmul.f32 %v1326_v51, %v1948_v9  ;;  %v1328_v62 = vpop.eup %1327 }
 0x10d   :  { %1341 = vrsqrt.f32 %v2011_v0  ;;  %v540_v21 = vsel %vm538_vm11, %v539_v63, %v537_v48  ;;  %v651_v26 = vand.u32 2147483648, %v1948_v9  ;;  %vm529_vm14 = vcmp.eq.f32.partialorder %v1981_v36, inf }
 0x10e   :  { %v956_v19 = vadd.f32 1e-05, %v1998_v49  ;;  %v1063_v20 = vsel %vm935_vm4, %v631_v44, %v1031_v10  ;;  %v1018_v15 = vmul.f32 %v1328_v62, %v540_v21  ;;  %v649_v22 = vsel %vm648_vm12, %v1948_v9, %v647_v11 }
 0x10f   :  { %vm531_vm15 = vcmp.eq.f32.partialorder %v1981_v36, 0.0  ;;  %v1330_v23 = vpop.eup %1329  ;;  %vm937_vm0 = vcmp.eq.f32.partialorder %v1954_v39, %v1728_v30  ;;  %v1079_v3 = vadd.f32 %v1063_v20, %v1047_v4  ;;  %v652_v32 = vsel %vm650_vm13, %v651_v26, %v649_v22 }
 0x110   :  { %v532_v33 = vand.u32 2147483648, %v1981_v36  ;;  %v2057_v45 = vmax.f32 %v1809_v6, 0.0  ;;  %v1332_v58 = vpop.eup %1331  ;;  %v1050_v7 = vsel %vm922_vm7, %v540_v21, %v1018_v15  ;;  %v1034_v52 = vmul.f32 %v1330_v23, %v652_v32 }
 0x111   :  { %vm641_vm1 = vcmp.eq.f32.partialorder %v1984_v37, inf  ;;  %v2066_v46 = vmax.f32 %v1818_v13, 0.0  ;;  %v1334_v9 = vpop.eup %1333  ;;  %v2069_v54 = vadd.f32 %v1970_v24, %v1079_v3  ;;  %v528_v6 = vmul.f32 %v1332_v58, %v1981_v36 }
 0x112   :  { %1343 = vrcp.f32 %v956_v19  ;;  %v972_v31 = vadd.f32 1e-05, %v2011_v0  ;;  %v1066_v12 = vsel %vm938_vm10, %v652_v32, %v1034_v52  ;;  %v640_v25 = vmul.f32 %v1334_v9, %v1984_v37 }
 0x113   :  { %v644_v56 = vand.u32 2147483648, %v1984_v37  ;;  %1345 = vrsqrt.f32 %v2057_v45  ;;  %v1336_v13 = vpop.eup %1335  ;;  %v2081_v24 = vadd.f32 %v1066_v12, %v1050_v7  ;;  %v530_v61 = vsel %vm529_vm14, %v1981_v36, %v528_v6  ;;  %v2100_v36 = vpop.permute.xlu1 %875 }
 0x114   :  { %v955_v63 = vadd.f32 1e-05, %v2057_v45  ;;  %v2088_v14 = vmax.f32 %v1834_v16, 0.0  ;;  %v533_v2 = vsel %vm531_vm15, %v532_v33, %v530_v61  ;;  %v642_v35 = vsel %vm641_vm1, %v1984_v37, %v640_v25 }
 0x115   :  { %v1338_v43 = vpop.eup %1337  ;;  %vm643_vm2 = vcmp.eq.f32.partialorder %v1984_v37, 0.0  ;;  %1347 = vrsqrt.f32 %v2066_v46  ;;  %v1017_v51 = vmul.f32 %v1336_v13, %v533_v2  ;;  %vm921_vm3 = vcmp.eq.f32.partialorder %v1932_v8, %v1723_v29  ;;  %v2111_v8 = vpop.permute.xlu0 %800 }
 0x116   :  { %v1340_v5 = vpop.eup %1339  ;;  %v645_v4 = vsel %vm643_vm2, %v644_v56, %v642_v35  ;;  %v549_v44 = vmul.f32 %v1338_v43, %v1998_v49  ;;  %1349 = vrcp.f32 %v972_v31  ;;  %v971_v48 = vadd.f32 1e-05, %v2066_v46 }
 0x117   :  { %v1342_v16 = vpop.eup %1341  ;;  %v1033_v10 = vmul.f32 %v1340_v5, %v645_v4  ;;  %1351 = vrcp.f32 %v955_v63  ;;  %v1049_v11 = vsel %vm921_vm3, %v533_v2, %v1017_v51  ;;  %vm550_vm4 = vcmp.eq.f32.partialorder %v1998_v49, inf  ;;  %v2133_v33 = vpop.permute.xlu1 %880 }
 0x118   :  { %v661_v37 = vmul.f32 %v1342_v16, %v2011_v0  ;;  %1353 = vrsqrt.f32 %v2088_v14  ;;  %v551_v21 = vsel %vm550_vm4, %v1998_v49, %v549_v44  ;;  %vm552_vm5 = vcmp.eq.f32.partialorder %v1998_v49, 0.0 }
 0x119   :  { %v1065_v62 = vsel %vm937_vm0, %v645_v4, %v1033_v10  ;;  %1355 = vrcp.f32 %v971_v48  ;;  %v553_v19 = vand.u32 2147483648, %v1998_v49  ;;  %vm662_vm6 = vcmp.eq.f32.partialorder %v2011_v0, inf  ;;  %v2159_v12 = vpop.permute.xlu0 %805 }
 0x11a   :  { %v2113_v26 = vadd.f32 %v1065_v62, %v1049_v11  ;;  %vm664_vm7 = vcmp.eq.f32.partialorder %v2011_v0, 0.0  ;;  %v663_v20 = vsel %vm662_vm6, %v2011_v0, %v661_v37  ;;  %v665_v39 = vand.u32 2147483648, %v2011_v0 }
 0x11b   :  { %vm543_vm8 = vcmp.eq.f32.partialorder %v2057_v45, inf  ;;  %v2122_v15 = vmax.f32 %v1841_v40, 0.0  ;;  %v2124_v23 = vsel %vm552_vm5, %v553_v19, %v551_v21  ;;  %vm545_vm9 = vcmp.eq.f32.partialorder %v2057_v45, 0.0  ;;  %v2180_v44 = vpop.permute.xlu1 %885 }
 0x11c   :  { %v1344_v22 = vpop.eup %1343  ;;  %v546_v49 = vand.u32 2147483648, %v2057_v45  ;;  %v2129_v3 = vmax.f32 %v1843_v41, 0.0  ;;  %vm923_vm10 = vcmp.eq.f32.partialorder %v2002_v38, %v1723_v29  ;;  %vm655_vm11 = vcmp.eq.f32.partialorder %v2066_v46, inf }
 0x11d   :  { %v1346_v32 = vpop.eup %1345  ;;  %vm657_vm12 = vcmp.eq.f32.partialorder %v2066_v46, 0.0  ;;  %v658_v40 = vand.u32 2147483648, %v2066_v46  ;;  %v2139_v58 = vmax.f32 %v1854_v53, 0.0  ;;  %v2143_v7 = vsel %vm664_vm7, %v665_v39, %v663_v20  ;;  %v2193_v37 = vpop.permute.xlu0 %810 }
 0x11e   :  { %v542_v41 = vmul.f32 %v1346_v32, %v2057_v45  ;;  %v958_v52 = vadd.f32 1e-05, %v2088_v14  ;;  %1357 = vrsqrt.f32 %v2122_v15  ;;  %vm939_vm13 = vcmp.eq.f32.partialorder %v2018_v34, %v1728_v30 }
 0x11f   :  { %v1348_v9 = vpop.eup %1347  ;;  %v2151_v6 = vmul.f32 %v1344_v22, %v2124_v23  ;;  %vm564_vm14 = vcmp.eq.f32.partialorder %v2088_v14, inf  ;;  %v567_v53 = vand.u32 2147483648, %v2088_v14  ;;  %1359 = vrsqrt.f32 %v2129_v3 }
 0x120   :  { %v2157_v0 = vmax.f32 %v1878_v1, 0.0  ;;  %v1350_v31 = vpop.eup %1349  ;;  %v544_v25 = vsel %vm543_vm8, %v2057_v45, %v542_v41  ;;  %v654_v56 = vmul.f32 %v1348_v9, %v2066_v46  ;;  %v974_v13 = vadd.f32 1e-05, %v2122_v15 }
 0x121   :  { %v2167_v61 = vmax.f32 %v1884_v27, 0.0  ;;  %v1352_v63 = vpop.eup %1351  ;;  %v2170_v43 = vmul.f32 %v1350_v31, %v2143_v7  ;;  %v547_v1 = vsel %vm545_vm9, %v546_v49, %v544_v25  ;;  %v957_v2 = vadd.f32 1e-05, %v2129_v3 }
 0x122   :  { %1361 = vrsqrt.f32 %v2139_v58  ;;  %v1354_v35 = vpop.eup %1353  ;;  %v1019_v5 = vmul.f32 %v1352_v63, %v547_v1  ;;  %v656_v51 = vsel %vm655_vm11, %v2066_v46, %v654_v56  ;;  %v679_v27 = vand.u32 2147483648, %v2122_v15  ;;  %v2246_v63 = vpop.permute.xlu0 %815 }
 0x123   :  { %1363 = vrcp.f32 %v958_v52  ;;  %v1356_v4 = vpop.eup %1355  ;;  %v659_v45 = vsel %vm657_vm12, %v658_v40, %v656_v51  ;;  %vm557_vm15 = vcmp.eq.f32.partialorder %v2129_v3, inf  ;;  %v973_v16 = vadd.f32 1e-05, %v2139_v58 }
 0x124   :  { %1365 = vrsqrt.f32 %v2157_v0  ;;  %v1035_v10 = vmul.f32 %v1356_v4, %v659_v45  ;;  %v563_v48 = vmul.f32 %v1354_v35, %v2088_v14  ;;  %vm559_vm0 = vcmp.eq.f32.partialorder %v2129_v3, 0.0 }
 0x125   :  { %1367 = vrcp.f32 %v974_v13  ;;  %vm676_vm1 = vcmp.eq.f32.partialorder %v2122_v15, inf  ;;  %v560_v11 = vand.u32 2147483648, %v2129_v3  ;;  %vm669_vm2 = vcmp.eq.f32.partialorder %v2139_v58, inf }
 0x126   :  { %1369 = vrcp.f32 %v957_v2  ;;  %v960_v46 = vadd.f32 1e-05, %v2157_v0  ;;  %v2198_v62 = vsel %vm923_vm10, %v547_v1, %v1019_v5  ;;  %vm671_vm3 = vcmp.eq.f32.partialorder %v2139_v58, 0.0 }
 0x127   :  { %v672_v21 = vand.u32 2147483648, %v2139_v58  ;;  %1371 = vrsqrt.f32 %v2167_v61  ;;  %v976_v19 = vadd.f32 1e-05, %v2167_v61  ;;  %v2205_v20 = vmax.f32 %v1886_v57, 0.0  ;;  %v2221_v57 = vpop.permute.xlu1 %890 }
 0x128   :  { %1373 = vrcp.f32 %v973_v16  ;;  %v2208_v39 = vmax.f32 %v1895_v28, 0.0  ;;  %v1358_v22 = vpop.eup %1357  ;;  %v2213_v38 = vsel %vm939_vm13, %v659_v45, %v1035_v10  ;;  %v2218_v49 = vsel %vm564_vm14, %v2088_v14, %v563_v48 }
 0x129   :  { %v581_v32 = vand.u32 2147483648, %v2157_v0  ;;  %1375 = vrcp.f32 %v960_v46  ;;  %v1360_v40 = vpop.eup %1359  ;;  %vm578_vm4 = vcmp.eq.f32.partialorder %v2157_v0, inf  ;;  %v693_v28 = vand.u32 2147483648, %v2167_v61 }
 0x12a   :  { %1377 = vrsqrt.f32 %v2205_v20  ;;  %v2227_v34 = vmax.f32 %v1912_v18, 0.0  ;;  %v2230_v41 = vmax.f32 %v1916_v42, 0.0  ;;  %vm566_vm5 = vcmp.eq.f32.partialorder %v2088_v14, 0.0 }
 0x12b   :  { %v675_v52 = vmul.f32 %v1358_v22, %v2122_v15  ;;  %v556_v9 = vmul.f32 %v1360_v40, %v2129_v3  ;;  %v959_v31 = vadd.f32 1e-05, %v2205_v20  ;;  %1379 = vrsqrt.f32 %v2208_v39  ;;  %v2273_v48 = vpop.permute.xlu1 %895 }
 0x12c   :  { %v1362_v25 = vpop.eup %1361  ;;  %1381 = vrcp.f32 %v976_v19  ;;  %v574_v56 = vand.u32 2147483648, %v2205_v20  ;;  %v2239_v18 = vmax.f32 %v1918_v59, 0.0  ;;  %v2242_v42 = vmax.f32 %v1925_v55, 0.0 }
 0x12d   :  { %v2244_v13 = vpop.eup %1363  ;;  %v558_v1 = vsel %vm557_vm15, %v2129_v3, %v556_v9  ;;  %v668_v2 = vmul.f32 %v1362_v25, %v2139_v58  ;;  %vm690_vm6 = vcmp.eq.f32.partialorder %v2167_v61, inf  ;;  %1383 = vrcp.f32 %v959_v31  ;;  %v2298_v25 = vpop.permute.xlu0 %820 }
 0x12e   :  { %v975_v35 = vadd.f32 1e-05, %v2208_v39  ;;  %v1366_v59 = vpop.eup %1365  ;;  %vm678_vm7 = vcmp.eq.f32.partialorder %v2122_v15, 0.0  ;;  %v2257_v55 = vsel %vm559_vm0, %v560_v11, %v558_v1  ;;  %vm571_vm8 = vcmp.eq.f32.partialorder %v2205_v20, inf }
 0x12f   :  { %1385 = vrsqrt.f32 %v2227_v34  ;;  %v962_v5 = vadd.f32 1e-05, %v2227_v34  ;;  %v978_v51 = vadd.f32 1e-05, %v2230_v41  ;;  %v2263_v4 = vpop.eup %1367  ;;  %v677_v45 = vsel %vm676_vm1, %v2122_v15, %v675_v52 }
 0x130   :  { %v670_v3 = vsel %vm669_vm2, %v2139_v58, %v668_v2  ;;  %v577_v16 = vmul.f32 %v1366_v59, %v2157_v0  ;;  %vm573_vm9 = vcmp.eq.f32.partialorder %v2205_v20, 0.0  ;;  %1387 = vrcp.f32 %v975_v35  ;;  %v1370_v10 = vpop.eup %1369 }
 0x131   :  { %v2277_v11 = vsel %vm671_vm3, %v672_v21, %v670_v3  ;;  %vm683_vm10 = vcmp.eq.f32.partialorder %v2208_v39, inf  ;;  %vm685_vm11 = vcmp.eq.f32.partialorder %v2208_v39, 0.0  ;;  %1389 = vrcp.f32 %v962_v5  ;;  %v1372_v46 = vpop.eup %1371 }
 0x132   :  { %v2282_v19 = vmul.f32 %v1370_v10, %v2257_v55  ;;  %v686_v22 = vand.u32 2147483648, %v2208_v39  ;;  %1391 = vrsqrt.f32 %v2230_v41  ;;  %v961_v40 = vadd.f32 1e-05, %v2239_v18  ;;  %v1374_v52 = vpop.eup %1373 }
 0x133   :  { %vm924_vm12 = vcmp.eq.f32.partialorder %v2037_v17, %v1723_v29  ;;  %vm925_vm13 = vcmp.eq.f32.partialorder %v2079_v60, %v1723_v29  ;;  %v689_v58 = vmul.f32 %v1372_v46, %v2167_v61  ;;  %1393 = vrcp.f32 %v978_v51  ;;  %v1376_v31 = vpop.eup %1375 }
 0x134   :  { %v588_v21 = vand.u32 2147483648, %v2239_v18  ;;  %v977_v9 = vadd.f32 1e-05, %v2242_v42  ;;  %vm926_vm14 = vcmp.eq.f32.partialorder %v2111_v8, %v1723_v29  ;;  %vm927_vm15 = vcmp.eq.f32.partialorder %v2159_v12, %v1723_v29  ;;  %v1378_v35 = vpop.eup %1377 }
 0x135   :  { %v2301_v1 = vmul.f32 %v1374_v52, %v2277_v11  ;;  %1395 = vrsqrt.f32 %v2239_v18  ;;  %v579_v2 = vsel %vm578_vm4, %v2157_v0, %v577_v16  ;;  %vm580_vm0 = vcmp.eq.f32.partialorder %v2157_v0, 0.0  ;;  %v1380_v3 = vpop.eup %1379 }
 0x136   :  { %1397 = vrcp.f32 %v961_v40  ;;  %v700_v59 = vand.u32 2147483648, %v2242_v42  ;;  %v568_v5 = vsel %vm566_vm5, %v567_v53, %v2218_v49  ;;  %v582_v51 = vsel %vm580_vm0, %v581_v32, %v579_v2  ;;  %v1382_v14 = vpop.eup %1381  ;;  %v2332_v53 = vpop.permute.xlu1 %900 }
 0x137   :  { %vm942_vm4 = vcmp.eq.f32.partialorder %v2133_v33, %v1728_v30  ;;  %v570_v16 = vmul.f32 %v1378_v35, %v2205_v20  ;;  %1399 = vrsqrt.f32 %v2242_v42  ;;  %vm592_vm1 = vcmp.eq.f32.partialorder %v2227_v34, inf  ;;  %v1384_v10 = vpop.eup %1383 }
 0x138   :  { %vm594_vm3 = vcmp.eq.f32.partialorder %v2227_v34, 0.0  ;;  %v682_v0 = vmul.f32 %v1380_v3, %v2208_v39  ;;  %1401 = vrcp.f32 %v977_v9  ;;  %v595_v49 = vand.u32 2147483648, %v2227_v34 }
 0x139   :  { %v691_v32 = vsel %vm690_vm6, %v2167_v61, %v689_v58  ;;  %v572_v46 = vsel %vm571_vm8, %v2205_v20, %v570_v16  ;;  %v680_v40 = vsel %vm678_vm7, %v679_v27, %v677_v45  ;;  %vm692_vm0 = vcmp.eq.f32.partialorder %v2167_v61, 0.0  ;;  %v1386_v52 = vpop.eup %1385 }
 0x13a   :  { %vm704_vm2 = vcmp.eq.f32.partialorder %v2230_v41, inf  ;;  %v684_v58 = vsel %vm683_vm10, %v2208_v39, %v682_v0  ;;  %v575_v9 = vsel %vm573_vm9, %v574_v56, %v572_v46  ;;  %vm587_vm6 = vcmp.eq.f32.partialorder %v2239_v18, 0.0  ;;  %v1388_v27 = vpop.eup %1387 }
 0x13b   :  { %v694_v15 = vsel %vm692_vm0, %v693_v28, %v691_v32  ;;  %vm706_vm7 = vcmp.eq.f32.partialorder %v2230_v41, 0.0  ;;  %vm946_vm8 = vcmp.eq.f32.partialorder %v2332_v53, %v1728_v30  ;;  %vm697_vm5 = vcmp.eq.f32.partialorder %v2242_v42, inf  ;;  %v1390_v35 = vpop.eup %1389 }
 0x13c   :  { %v591_v45 = vmul.f32 %v1386_v52, %v2227_v34  ;;  %v687_v2 = vsel %vm685_vm11, %v686_v22, %v684_v58  ;;  %v707_v20 = vand.u32 2147483648, %v2230_v41  ;;  %v1022_v56 = vmul.f32 %v2244_v13, %v568_v5  ;;  %v1392_v0 = vpop.eup %1391  ;;  %v1403_v52 = vld [vmem:[%s2472_s3] ss:$0 sm:$0xff] }
 0x13d   :  { %vm699_vm9 = vcmp.eq.f32.partialorder %v2242_v42, 0.0  ;;  %v1023_v61 = vmul.f32 %v1384_v10, %v575_v9  ;;  %v1024_v28 = vmul.f32 %v1376_v31, %v582_v51  ;;  %v1038_v3 = vmul.f32 %v2263_v4, %v680_v40  ;;  %v1394_v4 = vpop.eup %1393 }
 0x13e   :  { %v1039_v16 = vmul.f32 %v1388_v27, %v687_v2  ;;  %v593_v32 = vsel %vm592_vm1, %v2227_v34, %v591_v45  ;;  %v1040_v46 = vmul.f32 %v1382_v14, %v694_v15  ;;  %v1052_v39 = vsel %vm924_vm12, %v2124_v23, %v2151_v6 }
 0x13f   :  { %v1053_v13 = vsel %vm925_vm13, %v2257_v55, %v2282_v19  ;;  %v596_v22 = vsel %vm594_vm3, %v595_v49, %v593_v32  ;;  %v703_v31 = vmul.f32 %v1392_v0, %v2230_v41  ;;  %v1054_v14 = vsel %vm926_vm14, %v568_v5, %v1022_v56  ;;  %v1396_v23 = vpop.eup %1395 }
 0x140   :  { %v1055_v17 = vsel %vm927_vm15, %v575_v9, %v1023_v61  ;;  %v1026_v6 = vmul.f32 %v1390_v35, %v596_v22  ;;  %vm2474_vm10 = vcmp.eq.f32.partialorder %v2193_v37, %v1723_v29  ;;  %vm2475_vm11 = vcmp.eq.f32.partialorder %v2059_v50, %v1728_v30  ;;  %v1398_v12 = vpop.eup %1397 }
 0x141   :  { %v1056_v60 = vsel %vm2474_vm10, %v582_v51, %v1024_v28  ;;  %v1068_v34 = vsel %vm2475_vm11, %v2143_v7, %v2170_v43  ;;  %vm2476_vm12 = vcmp.eq.f32.partialorder %v2100_v36, %v1728_v30  ;;  %v584_v55 = vmul.f32 %v1396_v23, %v2239_v18  ;;  %v1400_v7 = vpop.eup %1399 }
 0x142   :  { %v1069_v8 = vsel %vm2476_vm12, %v2277_v11, %v2301_v1  ;;  %v705_v37 = vsel %vm704_vm2, %v2230_v41, %v703_v31  ;;  %v1070_v19 = vsel %vm942_vm4, %v680_v40, %v1038_v3  ;;  %vm2477_vm13 = vcmp.eq.f32.partialorder %v2180_v44, %v1728_v30  ;;  %v1402_v1 = vpop.eup %1401 }
 0x143   :  { %v1071_v50 = vsel %vm2477_vm13, %v687_v2, %v1039_v16  ;;  %v708_v36 = vsel %vm706_vm7, %v707_v20, %v705_v37  ;;  %vm2478_vm14 = vcmp.eq.f32.partialorder %v2298_v25, %v1723_v29  ;;  %vm2479_vm15 = vcmp.eq.f32.partialorder %v2221_v57, %v1728_v30  ;;  %v1404_v30 = vld [vmem:[%s2472_s3 + $0x1] ss:$0 sm:$0xff]  ;;  %s1432_s3 = smov [#allocation2]  }
 0x144   :  { %v1058_v43 = vsel %vm2478_vm14, %v596_v22, %v1026_v6  ;;  %v1072_v11 = vsel %vm2479_vm15, %v694_v15, %v1040_v46  ;;  %v1083_v33 = vadd.f32 %v2213_v38, %v2198_v62  ;;  %v696_v5 = vmul.f32 %v1400_v7, %v2242_v42  ;;  %s1121_s21 = sshll.u32 %s1432_s3, 4  ;;  %s1122_s21 = int_to_ptr.vmem [resolvable:$true] %s1121_s21 }
 0x145   :  { %vm2480_vm1 = vcmp.eq.f32.partialorder %v2239_v18, inf  ;;  %v1042_v41 = vmul.f32 %v1394_v4, %v708_v36  ;;  %v1084_v51 = vadd.f32 %v1068_v34, %v1052_v39  ;;  %v1085_v25 = vadd.f32 %v1069_v8, %v1053_v13  ;;  %s1405_s22 = scalar_lea.vmem %s1122_s21, 16  ;;  %s1409_s23 = scalar_lea.vmem %s1122_s21, 32 }
 0x146   :  { %v586_v44 = vsel %vm2480_vm1, %v2239_v18, %v584_v55  ;;  %v1086_v57 = vadd.f32 %v1070_v19, %v1054_v14  ;;  %v1087_v49 = vadd.f32 %v1071_v50, %v1055_v17  ;;  %v698_v62 = vsel %vm697_vm5, %v2242_v42, %v696_v5  ;;  %p1406_p0 = scmp.ne.s32.totalorder %s1122_s21, %s1405_s22  ;;  %p1410_p1 = scmp.lt.s32.totalorder %s1122_s21, %s1122_s21 }
 0x147   :  { %v589_v29 = vsel %vm587_vm6, %v588_v21, %v586_v44  ;;  %v1074_v10 = vsel %vm946_vm8, %v708_v36, %v1042_v41  ;;  %v1088_v40 = vadd.f32 %v1072_v11, %v1056_v60  ;;  %vm929_vm2 = vcmp.eq.f32.partialorder %v2246_v63, %v1403_v52  ;;  %p1411_p2 = scmp.lt.s32.totalorder %s1409_s23, %s1405_s22 }
 0x148   :  { %v1025_v38 = vmul.f32 %v1398_v12, %v589_v29  ;;  %v701_v18 = vsel %vm699_vm9, %v700_v59, %v698_v62  ;;  %v1090_v21 = vadd.f32 %v1074_v10, %v1058_v43  ;;  %v1095_v58 = vadd.f32 %v2069_v54, %v1993_v47 }
 0x149   :  { %v1041_v9 = vmul.f32 %v1402_v1, %v701_v18  ;;  %vm945_vm3 = vcmp.eq.f32.partialorder %v2273_v48, %v1404_v30  ;;  %v1112_v48 = vld [vmem:[#allocation2] sm:$0x1]  ;;  %p1412_p3 = por %p1411_p2, %p1410_p1 }
 0x14a   :  { %v1057_v15 = vsel %vm929_vm2, %v589_v29, %v1025_v38  ;;  %v1096_v53 = vadd.f32 %v1095_v58, %v2113_v26 }
 0x14b   :  { %v1073_v63 = vsel %vm945_vm3, %v701_v18, %v1041_v9  ;;  %p1413_p4 = pnand %p1412_p3, %p1406_p0 }
 0x14c   :  { %v1089_v27 = vadd.f32 %v1073_v63, %v1057_v15  ;;  %v1097_v45 = vadd.f32 %v1096_v53, %v2081_v24 }
 0x14e   :  { %v1098_v42 = vadd.f32 %v1097_v45, %v1083_v33 }
 0x150   :  { %v1099_v59 = vadd.f32 %v1098_v42, %v1084_v51 }
 0x152   :  { %v1100_v2 = vadd.f32 %v1099_v59, %v1085_v25 }
 0x154   :  { %v1101_v20 = vadd.f32 %v1100_v2, %v1086_v57 }
 0x156   :  { %v1102_v56 = vadd.f32 %v1101_v20, %v1087_v49 }
 0x158   :  { %v1103_v47 = vadd.f32 %v1102_v56, %v1088_v40 }
 0x15a   :  { %v1104_v54 = vadd.f32 %v1103_v47, %v1089_v27 }
 0x15c   :  { %v1105_v35 = vadd.f32 %v1104_v54, %v1090_v21 }
 0x15e   :  { %v1106_v61 = vrot.slane %v1105_v35, 4 }
 0x160   :  { %v1107_v28 = vadd.f32 %v1106_v61, %v1105_v35 }
 0x162   :  { %v1108_v3 = vrot.slane %v1107_v28, 2 }
 0x164   :  { %v1109_v16 = vadd.f32 %v1108_v3, %v1107_v28 }
 0x166   :  { %v1110_v0 = vrot.slane %v1109_v16, 1 }
 0x168   :  { %v1111_v26 = vadd.f32 %v1110_v0, %v1109_v16 }
 0x16a   :  { %v1113_v32 = vadd.f32 %v1112_v48, %v1111_v26 }
 0x16c   :  { %1114 = vst [vmem:[#allocation2] sm:$0x1] %v1113_v32 }
 0x16d   :  { %1416 = shalt.err (!%p1413_p4)
}
 0x16e   :  { %s1417_s26 = scalar_lea.hbm %s2473_s4, 16 }
 0x16f   :  { %p1418_p5 = scmp.ne.s32.totalorder %s2473_s4, %s1417_s26  ;;  %p1421_p6 = scmp.lt.u32.totalorder %s1417_s26, %s2473_s4 }
 0x171   :  { %p1423_p7 = pnand %p1421_p6, %p1418_p5 }
 0x173   :  { %1426 = shalt.err (!%p1423_p7)
}
 0x174   :  { %1124 = dma.vmem_to_hbm [thread:$0]  %s1122_s21, 16, %s2473_s4, [#allocation3]  }
 0x175   :  { %1427 = dma.done.wait [#allocation3], 16  }
 0x176   :  { %1428 = vsyncadd [#allocation3], 4294967280 }
 0x177   :  { %1128 = vsyncpa [#allocation3], 1 }

</bundles_post_ra>
